<compile_context>
chip_gen: v5e
topology: v5e:2x2
jax: 0.10.0
libtpu: 0.0.40
codegen_flags: <defaults>
</compile_context>

<pallas_src>
import functools
import math

import jax
import jax.numpy as jnp
from jax.experimental import pallas as pl
from jax.experimental.pallas import tpu as pltpu


def _round_up(x, m):
    return ((x + m - 1) // m) * m


def _kmeans_assign_kernel(feats_ref, cent_ref, cnorm_ref, labels_ref, *, k):
    """Assign each sample of the feats tile to its nearest centroid.

    Transposed layout: the (K, TN) score keeps the per-sample argmin on the
    sublane axis so labels are written as a lane-dense (1, TN) row.
    """
    f = feats_ref[...]                      # (TN, D), native dtype
    c = cent_ref[...]                       # (K, D), same dtype as feats
    c_norm = cnorm_ref[...]                 # (K, 1), float32 (precomputed)

    # cross^T = c @ f.T contracted over D -> (K, TN) on the MXU, f32 accum.
    # Default matmul precision: a distance argmin does not need the multi-pass
    # HIGHEST f32 emulation.
    cross_t = jax.lax.dot_general(
        c, f,
        dimension_numbers=(((1,), (1,)), ((), ())),
        preferred_element_type=jnp.float32,
    )

    # Squared distance minus the per-sample |f|^2 term (constant across the
    # cluster axis): sqrt / clamp / |f|^2 all drop, argmin is unchanged.
    score = c_norm - 2.0 * cross_t                            # (K, TN) f32

    # argmin over clusters (sublane axis), first-occurrence tie break.
    row = jax.lax.broadcasted_iota(jnp.int32, score.shape, 0)
    min_val = jnp.min(score, axis=0, keepdims=True)           # (1, TN)
    labels = jnp.min(jnp.where(score == min_val, row, k),
                     axis=0, keepdims=True)                   # (1, TN)
    # Guard degenerate (e.g. all-NaN) samples so labels stay in range.
    labels_ref[...] = jnp.minimum(labels, k - 1).astype(jnp.int32)


_FEATS_VMEM_BUDGET = 16 * 1024 * 1024   # bytes for the pipelined feats buffers
_MAX_VMEM_LIMIT = 64 * 1024 * 1024      # v7x physical VMEM per TensorCore


def kmeans_quantizer_forward(feats, centroids):
    """feats: (*batch_shape, D); centroids: (K, D).

    Returns (labels[*batch_shape] int32, assigned_centroids[*batch_shape, D]).
    NOTE: for max HBM-bandwidth efficiency, stream feats as bf16 if numerics
    allow — the kernel accumulates the cross term in f32 regardless.
    """
    batch_shape = feats.shape[:-1]
    d = feats.shape[-1]
    k = centroids.shape[0]

    # PyTorch forward does `centroids = self.centroids.to(feats)`.
    centroids = centroids.astype(feats.dtype)

    feats2d = feats.reshape(-1, d)
    n = feats2d.shape[0]
    itemsize = jnp.dtype(feats.dtype).itemsize
    lane_d = _round_up(d, 128)              # lanes the feats tile occupies in VMEM

    # --- Row tile from an explicit VMEM budget (up to 3 feats buffers). -----
    max_tile = max(_FEATS_VMEM_BUDGET // (3 * lane_d * itemsize), 128)
    max_tile = (max_tile // 128) * 128
    tile = min(max_tile, _round_up(n, 128))

    # Megacore-friendly splitting: aim for an even number of grid steps >= 2
    # once there is enough work (v7x has 2 TCs; on single-TC v5e/v6e an extra
    # step only costs ~0.35 us).  Never shrink below 128 rows.
    steps = math.ceil(n / tile)
    if n > 256:
        target = 2 if steps == 1 else steps + (steps % 2)
        if target != steps:
            tile = max(min(tile, _round_up(math.ceil(n / target), 128)), 128)

    n_pad = _round_up(n, tile)
    if n_pad != n:
        feats2d = jnp.pad(feats2d, ((0, n_pad - n), (0, 0)))
    grid_steps = n_pad // tile

    # Hoisted centroid prep: |c|^2 computed once, passed as a tiny input.
    c_norm = jnp.sum(jnp.square(centroids.astype(jnp.float32)),
                     axis=-1, keepdims=True)                  # (K, 1) f32

    # Deeper pipelining for the streamed input once the grid is long enough;
    # centroid blocks stay default (replicated & tiny).
    if grid_steps >= 3:
        feats_spec = pl.BlockSpec((tile, d), lambda i: (i, 0),
                                  pipeline_mode=pl.Buffered(3))
        n_feat_bufs = 3
    else:
        feats_spec = pl.BlockSpec((tile, d), lambda i: (i, 0))
        n_feat_bufs = 2

    # Scoped-VMEM limit matching the actual footprint (2x headroom), capped at
    # v7x's 64 MiB physical per-TC VMEM (safe on v5e/v6e's 128 MiB too).
    vmem_est = (n_feat_bufs * tile * lane_d * itemsize            # feats buffers
                + 2 * _round_up(k, 8) * lane_d * itemsize         # centroids
                + 2 * _round_up(k, 8) * 128 * 4                   # |c|^2
                + 2 * 8 * tile * 4)                               # labels out
    vmem_limit = int(min(max(2 * vmem_est, 16 * 1024 * 1024), _MAX_VMEM_LIMIT))

    labels_row = pl.pallas_call(
        functools.partial(_kmeans_assign_kernel, k=k),
        out_shape=jax.ShapeDtypeStruct((1, n_pad), jnp.int32),
        grid_spec=pltpu.PrefetchScalarGridSpec(
            num_scalar_prefetch=0,
            grid=(grid_steps,),
            in_specs=[
                feats_spec,                                   # streamed row tile
                pl.BlockSpec((k, d), lambda i: (0, 0)),       # centroids (replicated)
                pl.BlockSpec((k, 1), lambda i: (0, 0)),       # |c|^2 (replicated)
            ],
            out_specs=pl.BlockSpec((1, tile), lambda i: (0, i)),  # lane-dense labels
        ),
        compiler_params=pltpu.CompilerParams(
            dimension_semantics=("parallel",),
            vmem_limit_bytes=vmem_limit),
    )(feats2d, centroids, c_norm)

    labels = labels_row[0, :n].reshape(batch_shape)
    # Centroid gather outside the kernel (K tiny): XLA lowers this to a small
    # one-hot matmul with lane-dense writes; kernel writeback bytes stay small.
    assigned = jnp.take(centroids, labels, axis=0)
    return labels, assigned


def _reference_forward(feats, centroids):
    """Plain-JAX reference of the PyTorch forward (normalize=None)."""
    batch_shape = feats.shape[:-1]
    d = feats.shape[-1]
    f = feats.reshape(-1, d).astype(jnp.float32)
    c = centroids.astype(jnp.float32)
    f_norm = jnp.sum(f * f, axis=-1)[:, None]
    c_norm = jnp.sum(c * c, axis=-1)[None, :]
    cross = jnp.matmul(f, c.T, precision=jax.lax.Precision.HIGHEST)
    dist = jnp.sqrt(jnp.maximum(f_norm + c_norm - 2.0 * cross, 0.0))
    labels = jnp.argmin(dist, axis=-1).astype(jnp.int32)
    assigned = c[labels].astype(feats.dtype)
    return labels.reshape(batch_shape), assigned.reshape(*batch_shape, d), dist


if __name__ == "__main__":
    batch, seq, num_features, num_clusters = 2, 64, 32, 4

    key = jax.random.PRNGKey(0)
    feats = jax.random.normal(key, (batch, seq, num_features), dtype=jnp.float32)

    # Deterministic centroid init (stand-in for _init_centroids "random"):
    # pick evenly spaced samples from the flattened batch.
    flat = feats.reshape(-1, num_features)
    idx = jnp.arange(num_clusters) * (flat.shape[0] // num_clusters)
    centroids = flat[idx]

    labels, assigned = kmeans_quantizer_forward(feats, centroids)
    labels = jax.block_until_ready(labels)
    assigned = jax.block_until_ready(assigned)

    ref_labels, ref_assigned, ref_dist = _reference_forward(feats, centroids)

    assert labels.shape == (batch, seq) and labels.dtype == jnp.int32
    assert assigned.shape == (batch, seq, num_features)

    # Robust correctness check: the kernel's chosen centroid must attain the
    # minimum pairwise distance (within fp tolerance); exact label equality is
    # also expected here but can only legitimately differ on exact ties.
    flat_lab = labels.reshape(-1)
    d_pick = jnp.take_along_axis(ref_dist, flat_lab[:, None], axis=1)[:, 0]
    assert bool(jnp.all(d_pick <= ref_dist.min(axis=1) + 1e-4))
    assert float(jnp.mean(labels == ref_labels)) >= 0.99
    assert bool(jnp.allclose(
        assigned,
        jnp.take(centroids.astype(feats.dtype), flat_lab, axis=0
                 ).reshape(assigned.shape)))

    print("KERNEL_OK")
</pallas_src>

<mosaic_0001>
module attributes {stable_mosaic.version = 11 : i64} {
  func.func @_kmeans_assign_kernel(%arg0: i32, %arg1: memref<128x32xf32, #tpu.memory_space<vmem>>, %arg2: memref<4x32xf32, #tpu.memory_space<vmem>>, %arg3: memref<4x1xf32, #tpu.memory_space<vmem>>, %arg4: memref<1x128xi32, #tpu.memory_space<vmem>>) attributes {dimension_semantics = [#tpu.dimension_semantics<parallel>], iteration_bounds = array<i64: 1>, scalar_prefetch = 0 : i64, scratch_operands = 0 : i64, tpu.core_type = #tpu.core_type<tc>, window_params = [{transform_indices = @transform_0, window_bounds = array<i64: 128, 32>}, {pipeline_mode = #tpu.pipeline_mode<synchronous>, transform_indices = @transform_1, window_bounds = array<i64: 4, 32>}, {pipeline_mode = #tpu.pipeline_mode<synchronous>, transform_indices = @transform_2, window_bounds = array<i64: 4, 1>}, {transform_indices = @transform_3, window_bounds = array<i64: 1, 128>}]} {
    %c0 = arith.constant 0 : index
    %c0_0 = arith.constant 0 : index
    %0 = vector.load %arg1[%c0, %c0_0] : memref<128x32xf32, #tpu.memory_space<vmem>>, vector<128x32xf32>
    %c0_1 = arith.constant 0 : index
    %c0_2 = arith.constant 0 : index
    %1 = vector.load %arg2[%c0_1, %c0_2] : memref<4x32xf32, #tpu.memory_space<vmem>>, vector<4x32xf32>
    %c0_3 = arith.constant 0 : index
    %c0_4 = arith.constant 0 : index
    %2 = vector.load %arg3[%c0_3, %c0_4] : memref<4x1xf32, #tpu.memory_space<vmem>>, vector<4x1xf32>
    %cst = arith.constant dense<0.000000e+00> : vector<4x128xf32>
    %3 = tpu.matmul %1, %0, %cst {dimension_numbers = #tpu.dot_dimension_numbers<[1], [1], [0], [0], [0, 0, 1, 0], [], []>} : vector<4x32xf32>, vector<128x32xf32>, vector<4x128xf32> -> vector<4x128xf32>
    %cst_5 = arith.constant 2.000000e+00 : f32
    %4 = vector.broadcast %cst_5 : f32 to vector<4x128xf32>
    %5 = arith.mulf %4, %3 : vector<4x128xf32>
    %6 = vector.broadcast %2 : vector<4x1xf32> to vector<4x128xf32>
    %7 = arith.subf %6, %5 : vector<4x128xf32>
    %8 = tpu.iota {dimensions = array<i32: 0>} : vector<4x128xi32>
    %cst_6 = arith.constant dense<0x7F800000> : vector<128xf32>
    %9 = vector.multi_reduction <minimumf>, %7, %cst_6 [0] : vector<4x128xf32> to vector<128xf32>
    %10 = vector.shape_cast %9 : vector<128xf32> to vector<1x128xf32>
    %11 = vector.broadcast %10 : vector<1x128xf32> to vector<4x128xf32>
    %12 = arith.cmpf oeq, %7, %11 : vector<4x128xf32>
    %c4_i32 = arith.constant 4 : i32
    %13 = vector.broadcast %c4_i32 : i32 to vector<4x128xi32>
    %14 = arith.select %12, %8, %13 : vector<4x128xi1>, vector<4x128xi32>
    %cst_7 = arith.constant dense<2147483647> : vector<128xi32>
    %15 = vector.multi_reduction <minsi>, %14, %cst_7 [0] : vector<4x128xi32> to vector<128xi32>
    %16 = vector.shape_cast %15 : vector<128xi32> to vector<1x128xi32>
    %c3_i32 = arith.constant 3 : i32
    %17 = vector.broadcast %c3_i32 : i32 to vector<1x128xi32>
    %18 = arith.minsi %16, %17 : vector<1x128xi32>
    %c0_8 = arith.constant 0 : index
    %c0_9 = arith.constant 0 : index
    %19 = vector.load %arg4[%c0_8, %c0_9] : memref<1x128xi32, #tpu.memory_space<vmem>>, vector<1x128xi32>
    tpu.vector_store %arg4[%c0_8, %c0_9], %18 {strides = array<i32>} : memref<1x128xi32, #tpu.memory_space<vmem>>, vector<1x128xi32>,
    return
  }
  func.func @transform_0(%arg0: i32) -> (i32, i32) {
    %c0_i32 = arith.constant 0 : i32
    %c0_i32_0 = arith.constant 0 : i32
    return %arg0, %c0_i32 : i32, i32
  }
  func.func @transform_1(%arg0: i32) -> (i32, i32) {
    %c0_i32 = arith.constant 0 : i32
    %c0_i32_0 = arith.constant 0 : i32
    %c0_i32_1 = arith.constant 0 : i32
    return %c0_i32, %c0_i32_0 : i32, i32
  }
  func.func @transform_2(%arg0: i32) -> (i32, i32) {
    %c0_i32 = arith.constant 0 : i32
    %c0_i32_0 = arith.constant 0 : i32
    %c0_i32_1 = arith.constant 0 : i32
    return %c0_i32, %c0_i32_0 : i32, i32
  }
  func.func @transform_3(%arg0: i32) -> (i32, i32) {
    %c0_i32 = arith.constant 0 : i32
    %c0_i32_0 = arith.constant 0 : i32
    return %c0_i32, %arg0 : i32, i32
  }
}

</mosaic_0001>

<bundles_post_ra>
// kernel: tpu_custom_call.1
= control target key start
LH: loop header
LB: loop body
LE: loop exit
PB: predicated region body
PF: predicated region fallthrough
CT: control target
= control target key end

     0   :  { %vm33_vm0 = vcmask 261120   ;;  %s295_s0 = inlined_call_operand.vmem [shape: f32[128,32], index: 0, kind: input, shape index: {}]   ;;  %s296_s1 = inlined_call_operand.vmem [shape: f32[4,32], index: 1, kind: input, shape index: {}]   ;;  %s297_s2 = inlined_call_operand.vmem [shape: f32[4,1], index: 2, kind: input, shape index: {}]   ;;  %s298_s3 = inlined_call_operand.hbm [shape: s32[1,128], index: 3, kind: output, shape index: {}]  }
   0x1   :  { %v30_v0 = vld [vmem:[%s295_s0 + $0x78] sm:$0xff]  ;;  %v29_v1 = vld [vmem:[%s295_s0 + $0x70] sm:$0xff] }
   0x2   :  { %153 = vmatpush.xpose.msk.msra.mxu0 %vm33_vm0, %v30_v0 }
   0x3   :  { %8 = vsyncpa [#allocation3], 0  ;;  %v28_v2 = vld [vmem:[%s295_s0 + $0x68] sm:$0xff]  ;;  %v27_v3 = vld [vmem:[%s295_s0 + $0x60] sm:$0xff]  ;;  %v199_v10 = vmov 0   ;;  %vm114_vm1 = vcmask 1043456   ;;  %v112_v27 = vlaneseq }
   0x4   :  { %v26_v4 = vld [vmem:[%s295_s0 + $0x58] sm:$0xff]  ;;  %v25_v5 = vld [vmem:[%s295_s0 + $0x50] sm:$0xff]  ;;  %v24_v6 = vld [vmem:[%s295_s0 + $0x48] sm:$0xff]  ;;  %172 = vset.pattern.permute.xlu0 %v199_v10  ;;  %s144_s22 = sshll.u32 %s298_s3, 4  ;;  %s145_s22 = int_to_ptr.hbm [resolvable:$true] %s144_s22 }
   0x5   :  { %v23_v7 = vld [vmem:[%s295_s0 + $0x40] sm:$0xff]  ;;  %v22_v8 = vld [vmem:[%s295_s0 + $0x38] sm:$0xff]  ;;  %v21_v11 = vld [vmem:[%s295_s0 + $0x30] sm:$0xff]  ;;  %v113_v30 = vshrl.u32 %v112_v27, 7 }
   0x6   :  { %154 = vmatpush.xpose.msk.msra.mxu0 %vm33_vm0, %v29_v1  ;;  %v32_v9 = vld [vmem:[%s297_s2] sm:$0xf]  ;;  %v20_v12 = vld [vmem:[%s295_s0 + $0x28] sm:$0xff]  ;;  %v18_v14 = vld [vmem:[%s295_s0 + $0x18] sm:$0xff] }
   0x7   :  { %108 = vperm.xlu0 %172, %v32_v9   ;;  %v19_v13 = vld [vmem:[%s295_s0 + $0x20] sm:$0xff]  ;;  %v17_v15 = vld [vmem:[%s295_s0 + $0x10] sm:$0xff]  ;;  %v16_v16 = vld [vmem:[%s295_s0 + $0x8] sm:$0xff] }
   0x8   :  { %v15_v17 = vld [vmem:[%s295_s0] sm:$0xff]  ;;  %s200_s0 = smov [#allocation2]  }
   0x9   :  { %v31_v18 = vld [vmem:[%s296_s1] sm:$0xf]  ;;  %s142_s1 = sshll.u32 %s200_s0, 4  ;;  %s143_s1 = int_to_ptr.vmem [resolvable:$true] %s142_s1 }
   0xa   :  { %155 = vmatpush.xpose.msk.msra.mxu0 %vm33_vm0, %v28_v2 }
   0xe   :  { %156 = vmatpush.xpose.msk.msra.mxu0 %vm33_vm0, %v27_v3 }
  0x12   :  { %157 = vmatpush.xpose.msk.msra.mxu0 %vm33_vm0, %v26_v4 }
  0x16   :  { %158 = vmatpush.xpose.msk.msra.mxu0 %vm33_vm0, %v25_v5 }
  0x1a   :  { %159 = vmatpush.xpose.msk.msra.mxu0 %vm33_vm0, %v24_v6 }
  0x1e   :  { %160 = vmatpush.xpose.msk.msra.mxu0 %vm33_vm0, %v23_v7 }
  0x22   :  { %161 = vmatpush.xpose.msk.msra.mxu0 %vm33_vm0, %v22_v8 }
  0x26   :  { %162 = vmatpush.xpose.msk.msra.mxu0 %vm33_vm0, %v21_v11 }
  0x2a   :  { %163 = vmatpush.xpose.msk.msra.mxu0 %vm33_vm0, %v20_v12 }
  0x2e   :  { %164 = vmatpush.xpose.msk.msra.mxu0 %vm33_vm0, %v19_v13 }
  0x32   :  { %165 = vmatpush.xpose.msk.msra.mxu0 %vm33_vm0, %v18_v14 }
  0x36   :  { %166 = vmatpush.xpose.msk.msra.mxu0 %vm33_vm0, %v17_v15 }
  0x3a   :  { %167 = vmatpush.xpose.msk.msra.mxu0 %vm33_vm0, %v16_v16 }
  0x3e   :  { %168 = vmatpush.xpose.msk.msra.mxu0 %vm33_vm0, %v15_v17 }
  0x41   :  { %169 = vmatmul.msk.f32.vlgmr.msra.gmra.mxu0 %vm33_vm0, %v31_v18 }
  0x79   :  { %v109_v20 = vpop.permute.xlu0 %108 }
  0xbe   :  { %v102_v19 = vpop.f32.mrf.mxu0 }
  0xbf   :  { %v105_v21 = vmul.f32 2.0, %v102_v19 }
  0xc1   :  { %v111_v22 = vsub.f32 %v109_v20, %v105_v21 }
  0xc3   :  { %v115_v23 = vsel %vm114_vm1, %v111_v22, inf }
  0xc4   :  { %v116_v24 = vrot.slane %v115_v23, 4 }
  0xc6   :  { %v117_v25 = vmin.f32 %v115_v23, %v116_v24 }
  0xc8   :  { %v118_v26 = vrot.slane %v117_v25, 2 }
  0xca   :  { %v119_v28 = vmin.f32 %v117_v25, %v118_v26 }
  0xcc   :  { %v120_v29 = vrot.slane %v119_v28, 1 }
  0xce   :  { %v121_v31 = vmin.f32 %v119_v28, %v120_v29 }
  0xd0   :  { %vm122_vm2 = vcmp.eq.f32.partialorder %v111_v22, %v121_v31 }
  0xd1   :  { %v123_v32 = vsel %vm122_vm2, %v113_v30, 4 }
  0xd2   :  { %v124_v33 = vsel %vm114_vm1, %v123_v32, 2147483647 }
  0xd3   :  { %v125_v34 = vrot.slane %v124_v33, 4 }
  0xd5   :  { %vm126_vm3 = vcmp.lt.s32.totalorder %v124_v33, %v125_v34 }
  0xd6   :  { %v127_v35 = vsel %vm126_vm3, %v124_v33, %v125_v34 }
  0xd7   :  { %v128_v36 = vrot.slane %v127_v35, 2 }
  0xd9   :  { %vm129_vm4 = vcmp.lt.s32.totalorder %v127_v35, %v128_v36 }
  0xda   :  { %v130_v37 = vsel %vm129_vm4, %v127_v35, %v128_v36 }
  0xdb   :  { %v131_v38 = vrot.slane %v130_v37, 1 }
  0xdd   :  { %vm132_vm5 = vcmp.lt.s32.totalorder %v130_v37, %v131_v38 }
  0xde   :  { %v133_v39 = vsel %vm132_vm5, %v130_v37, %v131_v38 }
  0xdf   :  { %vm134_vm6 = vcmp.lt.s32.totalorder %v133_v39, 3 }
  0xe0   :  { %v135_v40 = vsel %vm134_vm6, %v133_v39, 3 }
  0xe1   :  { %136 = vst [vmem:[#allocation2] sm:$0x1] %v135_v40 }
  0xe2   :  { %147 = dma.vmem_to_hbm [thread:$0]  %s143_s1, 16, %s145_s22, [#allocation3]  }
  0xe3   :  { %197 = dma.done.wait [#allocation3], 16  }
  0xe4   :  { %198 = vsyncadd [#allocation3], 4294967280 }
  0xe5   :  { %152 = vsyncpa [#allocation3], 1 }

</bundles_post_ra>
